<compile_context>
chip_gen: v5e
topology: v5e:2x2
jax: 0.10.0
libtpu: 0.0.40
codegen_flags: <defaults>
</compile_context>

<pallas_src>
import jax
import jax.numpy as jnp
from jax.experimental import pallas as pl
from jax.experimental.pallas import tpu as pltpu


def _round_up(x: int, m: int) -> int:
    return ((x + m - 1) // m) * m


def gmf_kernel(b_ref, w_ref, ue_ref, ie_ref, out_ref):
    """Hot path for one batch tile.

    b_ref   : (1,)    f32 SMEM  logit bias
    w_ref   : (F, 1)  f32 VMEM  logit weight (nn.Linear(F, 1).weight row, as column)
    ue_ref  : (F, TB) f32 VMEM  gathered user embeddings (factors x batch)
    ie_ref  : (F, TB) f32 VMEM  gathered item embeddings (factors x batch)
    out_ref : (1, TB) f32 VMEM  sigmoid(logit), lane-dense
    """
    h = ue_ref[...] * ie_ref[...]                                  # (F, TB)  VPU
    # Broadcast-multiply by the weight column, reduce across sublanes (XLU):
    # exactly h @ W^T, one full-density vmul per vreg + cross-sublane reduce.
    acc = jnp.sum(h * w_ref[...], axis=0, keepdims=True)          # (1, TB)
    out_ref[...] = jax.nn.sigmoid(acc + b_ref[0])                 # EUP, lane-dense store


def gmf_forward(users, items, params, *, tile_b: int = 32768):
    """Embedding gather (XLA glue, no batch-sized transpose) + Pallas GMF kernel."""
    user_w = params["user_embedding"]                              # (num_users, F)
    item_w = params["item_embedding"]                              # (num_items, F)
    logit_w = params["logit_w"].reshape(-1, 1).astype(jnp.float32)  # (F, 1)
    logit_b = params["logit_b"].reshape(-1).astype(jnp.float32)     # (1,)

    batch = users.shape[0]
    num_factors = user_w.shape[1]

    # --- batch tile selection -------------------------------------------------
    tile_b = max(128, _round_up(tile_b, 128))
    b_ceil = _round_up(batch, 128)
    tb = min(tile_b, b_ceil)
    # Keep >= 2 grid steps when the batch allows it so the "parallel" axis can
    # shard across both TensorCores on v7x (one extra cheap step on v5e/v6e).
    if b_ceil // tb < 2 and b_ceil >= 256:
        tb = _round_up(pl.cdiv(b_ceil, 2), 128)
    b_pad = _round_up(batch, tb)
    grid = (b_pad // tb,)

    # Pad the index vectors (index 0 is always valid); tail rows are sliced off.
    pad = b_pad - batch
    users_p = jnp.pad(users, (0, pad)) if pad else users
    items_p = jnp.pad(items, (0, pad)) if pad else items

    # Gather columns from pre-transposed (F, num_*) tables -> (F, B_pad) directly.
    # Only the small tables are transposed; no batch-sized transpose materializes.
    user_wt = user_w.astype(jnp.float32).T                         # (F, num_users)
    item_wt = item_w.astype(jnp.float32).T                         # (F, num_items)
    ue_t = jnp.take(user_wt, users_p, axis=1)                      # (F, B_pad)
    ie_t = jnp.take(item_wt, items_p, axis=1)                      # (F, B_pad)

    cost = pl.CostEstimate(
        flops=3 * num_factors * b_pad,                 # h mul + w mul + reduce add
        transcendentals=b_pad,                         # sigmoid
        bytes_accessed=(2 * num_factors * 4 + 4) * b_pad,
    )

    out = pl.pallas_call(
        gmf_kernel,
        grid=grid,
        in_specs=[
            pl.BlockSpec(memory_space=pltpu.MemorySpace.SMEM),         # logit bias
            pl.BlockSpec((num_factors, 1), lambda i: (0, 0)),          # logit weight col
            pl.BlockSpec((num_factors, tb), lambda i: (0, i)),         # user emb tile
            pl.BlockSpec((num_factors, tb), lambda i: (0, i)),         # item emb tile
        ],
        out_specs=pl.BlockSpec((1, tb), lambda i: (0, i)),
        out_shape=jax.ShapeDtypeStruct((1, b_pad), jnp.float32),
        compiler_params=pltpu.CompilerParams(
            dimension_semantics=("parallel",)),
        cost_estimate=cost,
    )(logit_b, logit_w, ue_t, ie_t)

    return out.reshape(-1)[:batch]                     # matches torch .view(-1)


def init_gmf_params(key, num_users, num_items, num_factors=8):
    """Synthetic init mirroring GMF._init_weight (std=0.01 normals).

    nn.Linear's bias keeps its default U(-1/sqrt(F), 1/sqrt(F)) init (not
    overridden in _init_weight), reproduced deterministically here.
    """
    k_u, k_i, k_w, k_b = jax.random.split(key, 4)
    bound = 1.0 / jnp.sqrt(jnp.float32(num_factors))
    return {
        "user_embedding": 0.01 * jax.random.normal(k_u, (num_users, num_factors), jnp.float32),
        "item_embedding": 0.01 * jax.random.normal(k_i, (num_items, num_factors), jnp.float32),
        "logit_w": 0.01 * jax.random.normal(k_w, (1, num_factors), jnp.float32),
        "logit_b": jax.random.uniform(k_b, (1,), jnp.float32, -bound, bound),
    }


if __name__ == "__main__":
    num_users, num_items, num_factors = 32, 48, 8
    batch = 8

    key = jax.random.PRNGKey(0)
    k_params, k_u_idx, k_i_idx = jax.random.split(key, 3)

    params = init_gmf_params(k_params, num_users, num_items, num_factors)
    users = jax.random.randint(k_u_idx, (batch,), 0, num_users, dtype=jnp.int32)
    items = jax.random.randint(k_i_idx, (batch,), 0, num_items, dtype=jnp.int32)

    def ref_forward(u, i):
        ue = params["user_embedding"][u]
        ie = params["item_embedding"][i]
        return jax.nn.sigmoid(
            (ue * ie) @ params["logit_w"].T + params["logit_b"]).reshape(-1)

    # Single-tile path (batch padded 8 -> 128).
    out = jax.block_until_ready(gmf_forward(users, items, params))
    ref = ref_forward(users, items)
    assert out.shape == (batch,)
    assert jnp.allclose(out, ref, atol=1e-6, rtol=1e-6), (out, ref)

    # Multi-tile path with a ragged tail (200 -> grid of 2 tiles of 128).
    batch2 = 200
    k_u2, k_i2 = jax.random.split(jax.random.PRNGKey(1))
    users2 = jax.random.randint(k_u2, (batch2,), 0, num_users, dtype=jnp.int32)
    items2 = jax.random.randint(k_i2, (batch2,), 0, num_items, dtype=jnp.int32)
    out2 = jax.block_until_ready(gmf_forward(users2, items2, params, tile_b=128))
    ref2 = ref_forward(users2, items2)
    assert out2.shape == (batch2,)
    assert jnp.allclose(out2, ref2, atol=1e-6, rtol=1e-6), (out2, ref2)

    # Default large-tile path with auto 2-step split (v7x dual-TC friendly).
    batch3 = 1024
    k_u3, k_i3 = jax.random.split(jax.random.PRNGKey(2))
    users3 = jax.random.randint(k_u3, (batch3,), 0, num_users, dtype=jnp.int32)
    items3 = jax.random.randint(k_i3, (batch3,), 0, num_items, dtype=jnp.int32)
    out3 = jax.block_until_ready(gmf_forward(users3, items3, params))
    ref3 = ref_forward(users3, items3)
    assert out3.shape == (batch3,)
    assert jnp.allclose(out3, ref3, atol=1e-6, rtol=1e-6), (out3, ref3)

    print("KERNEL_OK")
</pallas_src>

<mosaic_0001>
module attributes {stable_mosaic.version = 11 : i64} {
  func.func @gmf_kernel(%arg0: i32, %arg1: memref<1xf32, #tpu.memory_space<smem>>, %arg2: memref<8x1xf32, #tpu.memory_space<vmem>>, %arg3: memref<8x128xf32, #tpu.memory_space<vmem>>, %arg4: memref<8x128xf32, #tpu.memory_space<vmem>>, %arg5: memref<1x128xf32, #tpu.memory_space<vmem>>) attributes {dimension_semantics = [#tpu.dimension_semantics<parallel>], iteration_bounds = array<i64: 1>, scalar_prefetch = 0 : i64, scratch_operands = 0 : i64, tpu.core_type = #tpu.core_type<tc>, window_params = [{transform_indices = @transform_0, window_bounds = array<i64: 1>}, {pipeline_mode = #tpu.pipeline_mode<synchronous>, transform_indices = @transform_1, window_bounds = array<i64: 8, 1>}, {transform_indices = @transform_2, window_bounds = array<i64: 8, 128>}, {transform_indices = @transform_3, window_bounds = array<i64: 8, 128>}, {transform_indices = @transform_4, window_bounds = array<i64: 1, 128>}]} {
    %c0 = arith.constant 0 : index
    %c0_0 = arith.constant 0 : index
    %0 = vector.load %arg3[%c0, %c0_0] : memref<8x128xf32, #tpu.memory_space<vmem>>, vector<8x128xf32>
    %c0_1 = arith.constant 0 : index
    %c0_2 = arith.constant 0 : index
    %1 = vector.load %arg4[%c0_1, %c0_2] : memref<8x128xf32, #tpu.memory_space<vmem>>, vector<8x128xf32>
    %2 = arith.mulf %0, %1 : vector<8x128xf32>
    %c0_3 = arith.constant 0 : index
    %c0_4 = arith.constant 0 : index
    %3 = vector.load %arg2[%c0_3, %c0_4] : memref<8x1xf32, #tpu.memory_space<vmem>>, vector<8x1xf32>
    %4 = vector.broadcast %3 : vector<8x1xf32> to vector<8x128xf32>
    %5 = arith.mulf %2, %4 : vector<8x128xf32>
    %cst = arith.constant dense<0.000000e+00> : vector<128xf32>
    %6 = vector.multi_reduction <add>, %5, %cst [0] : vector<8x128xf32> to vector<128xf32>
    %7 = vector.shape_cast %6 : vector<128xf32> to vector<1x128xf32>
    %c0_5 = arith.constant 0 : index
    %8 = memref.load %arg1[%c0_5] : memref<1xf32, #tpu.memory_space<smem>>
    %9 = vector.broadcast %8 : f32 to vector<1x128xf32>
    %10 = arith.addf %7, %9 : vector<1x128xf32>
    %11 = arith.negf %10 : vector<1x128xf32>
    %12 = math.exp %11 : vector<1x128xf32>
    %cst_6 = arith.constant 1.000000e+00 : f32
    %13 = vector.broadcast %cst_6 : f32 to vector<1x128xf32>
    %14 = arith.addf %13, %12 : vector<1x128xf32>
    %15 = arith.divf %13, %14 : vector<1x128xf32>
    %c0_7 = arith.constant 0 : index
    %c0_8 = arith.constant 0 : index
    %16 = vector.load %arg5[%c0_7, %c0_8] : memref<1x128xf32, #tpu.memory_space<vmem>>, vector<1x128xf32>
    tpu.vector_store %arg5[%c0_7, %c0_8], %15 {strides = array<i32>} : memref<1x128xf32, #tpu.memory_space<vmem>>, vector<1x128xf32>,
    return
  }
  func.func @transform_0(%arg0: i32) -> i32 {
    %c0_i32 = arith.constant 0 : i32
    %c0_i32_0 = arith.constant 0 : i32
    return %c0_i32 : i32
  }
  func.func @transform_1(%arg0: i32) -> (i32, i32) {
    %c0_i32 = arith.constant 0 : i32
    %c0_i32_0 = arith.constant 0 : i32
    %c0_i32_1 = arith.constant 0 : i32
    return %c0_i32, %c0_i32_0 : i32, i32
  }
  func.func @transform_2(%arg0: i32) -> (i32, i32) {
    %c0_i32 = arith.constant 0 : i32
    %c0_i32_0 = arith.constant 0 : i32
    return %c0_i32, %arg0 : i32, i32
  }
  func.func @transform_3(%arg0: i32) -> (i32, i32) {
    %c0_i32 = arith.constant 0 : i32
    %c0_i32_0 = arith.constant 0 : i32
    return %c0_i32, %arg0 : i32, i32
  }
  func.func @transform_4(%arg0: i32) -> (i32, i32) {
    %c0_i32 = arith.constant 0 : i32
    %c0_i32_0 = arith.constant 0 : i32
    return %c0_i32, %arg0 : i32, i32
  }
}

</mosaic_0001>

<bundles_post_ra>
// kernel: tpu_custom_call.1
= control target key start
LH: loop header
LB: loop body
LE: loop exit
PB: predicated region body
PF: predicated region fallthrough
CT: control target
= control target key end

     0   :  { %10 = vsyncpa [#allocation4], 0  ;;  %s193_s0 = inlined_call_operand.<no memory space> [shape: f32[1], index: 0, kind: input, shape index: {}]   ;;  %s194_s1 = inlined_call_operand.vmem [shape: f32[8,1], index: 1, kind: input, shape index: {}]   ;;  %s195_s2 = inlined_call_operand.vmem [shape: f32[8,128], index: 2, kind: input, shape index: {}]   ;;  %s196_s3 = inlined_call_operand.hbm [shape: f32[8,128], index: 3, kind: input, shape index: {}]   ;;  %s197_s4 = inlined_call_operand.hbm [shape: f32[1,128], index: 4, kind: output, shape index: {}]  }
   0x1   :  { %11 = vsyncpa [#allocation5], 0  ;;  %s23_s17 = sshll.u32 %s196_s3, 4  ;;  %s150_s18 = smov [#allocation3]   ;;  %s24_s17 = int_to_ptr.hbm [resolvable:$true] %s23_s17 }
   0x2   :  { %s25_s19 = sshll.u32 %s150_s18, 4  ;;  %s26_s19 = int_to_ptr.vmem [resolvable:$true] %s25_s19 }
   0x3   :  { %28 = dma.hbm_to_vmem [thread:$0]  %s24_s17, 128, %s26_s19, [#allocation4]  }
   0x4   :  { %146 = dma.done.wait [#allocation4], 128  }
   0x5   :  { %147 = vsyncadd [#allocation4], 4294967168  ;;  %v151_v0 = vmov 0   ;;  %v36_v1 = vld [vmem:[%s194_s1] sm:$0xff]  ;;  %v50_v12 = vstv %s193_s0  ;;  %s152_s1 = smov [#allocation6]   ;;  %s79_s0 = sshll.u32 %s197_s4, 4  ;;  %s80_s0 = int_to_ptr.hbm [resolvable:$true] %s79_s0 }
   0x6   :  { %93 = vset.pattern.permute.xlu0 %v151_v0  ;;  %v33_v2 = vld [vmem:[%s195_s2] sm:$0xff]  ;;  %s77_s2 = sshll.u32 %s152_s1, 4  ;;  %s78_s2 = int_to_ptr.vmem [resolvable:$true] %s77_s2 }
   0x7   :  { %39 = vperm.xlu0 %93, %v36_v1   ;;  %v34_v3 = vld [vmem:[#allocation3] sm:$0xff] }
   0x8   :  { %v35_v4 = vmul.f32 %v34_v3, %v33_v2 }
  0x79   :  { %v40_v5 = vpop.permute.xlu0 %39 }
  0x7a   :  { %v42_v6 = vmul.f32 %v40_v5, %v35_v4 }
  0x7c   :  { %v43_v7 = vrot.slane %v42_v6, 4 }
  0x7e   :  { %v44_v8 = vadd.f32 %v43_v7, %v42_v6 }
  0x80   :  { %v45_v9 = vrot.slane %v44_v8, 2 }
  0x82   :  { %v46_v10 = vadd.f32 %v45_v9, %v44_v8 }
  0x84   :  { %v47_v11 = vrot.slane %v46_v10, 1 }
  0x86   :  { %v48_v13 = vadd.f32 %v47_v11, %v46_v10 }
  0x88   :  { %v51_v14 = vadd.f32 %v50_v12, %v48_v13 }
  0x8a   :  { %v89_v15 = vmul.f32 -1.442695, %v51_v14 }
  0x8c   :  { %94 = vpow2.f32 %v89_v15 }
  0x92   :  { %v95_v16 = vpop.eup %94 }
  0x93   :  { %v55_v17 = vadd.f32 1.0, %v95_v16 }
  0x95   :  { %96 = vrcp.f32 %v55_v17  ;;  %v67_v21 = vand.u32 2147483648, %v55_v17  ;;  %v65_v23 = vand.u32 2147483647, %v55_v17  ;;  %vm61_vm1 = vweird.f32 %v55_v17 }
  0x97   :  { %v68_v25 = vor.u32 1.1754944e-38, %v67_v21  ;;  %vm66_vm3 = vcmp.eq.f32.partialorder %v65_v23, 8.507059e+37 }
  0x9b   :  { %v97_v18 = vpop.eup %96 }
  0x9c   :  { %v57_v19 = vmul.f32 %v97_v18, %v55_v17  ;;  %vm62_vm0 = vweird.f32 %v97_v18 }
  0x9d   :  { %vm63_vm2 = vmor %vm61_vm1, %vm62_vm0 }
  0x9e   :  { %v58_v20 = vsub.f32 1.0, %v57_v19 }
  0xa0   :  { %v59_v22 = vmul.f32 %v97_v18, %v58_v20 }
  0xa2   :  { %v60_v24 = vadd.f32 %v97_v18, %v59_v22 }
  0xa4   :  { %v64_v26 = vsel %vm63_vm2, %v97_v18, %v60_v24 }
  0xa5   :  { %v69_v27 = vsel %vm66_vm3, %v68_v25, %v64_v26 }
  0xa6   :  { %71 = vst [vmem:[#allocation6] sm:$0x1] %v69_v27 }
  0xa7   :  { %82 = dma.vmem_to_hbm [thread:$0]  %s78_s2, 16, %s80_s0, [#allocation5]  }
  0xa8   :  { %148 = dma.done.wait [#allocation5], 16  }
  0xa9   :  { %149 = vsyncadd [#allocation5], 4294967280 }
  0xaa   :  { %87 = vsyncpa [#allocation4], 1 }
  0xab   :  { %88 = vsyncpa [#allocation5], 1 }

</bundles_post_ra>
